<compile_context>
chip_gen: v6e
topology: v6e:2x2x1
jax: 0.10.0
libtpu: 0.0.40
codegen_flags: <defaults>
</compile_context>

<pallas_src>
import functools
import math

import numpy as np

import jax
import jax.numpy as jnp
from jax.experimental import pallas as pl
from jax.experimental.pallas import tpu as pltpu

EPS = 1e-5  # PyTorch nn.LayerNorm default


# ----------------------------------------------------------------------------
# Kernels
# ----------------------------------------------------------------------------
def _layernorm_kernel(x_ref, g_ref, b_ref, o_ref, *, inv_dim):
    """General path: block is (tm, dim); normalize each row over the last axis.

    One-pass moments: var = E[x^2] - E[x]^2 (f32 accumulation), so the tile is
    traversed once fewer than the centered two-pass formulation.
    """
    x = x_ref[...].astype(jnp.float32)
    mean = jnp.sum(x, axis=-1, keepdims=True) * inv_dim
    meansq = jnp.sum(x * x, axis=-1, keepdims=True) * inv_dim
    var = jnp.maximum(meansq - mean * mean, 0.0)
    inv_std = jax.lax.rsqrt(var + EPS)
    y = (x - mean) * inv_std
    y = y * g_ref[...].astype(jnp.float32) + b_ref[...].astype(jnp.float32)
    o_ref[...] = y.astype(o_ref.dtype)


def _layernorm_fold_kernel(x_ref, g_ref, b_ref, r_ref, c_ref, o_ref, *, inv_dim):
    """Lane-dense path: each kernel row packs `fold` rows (d_block = fold*dim).

    r_ref (d_block, fold) reduces each segment's lanes (MXU does the cross-lane
    reduction); c_ref (fold, d_block) broadcasts per-segment scalars back over
    the segment's lanes.  Skinny matrices keep the MXU work negligible vs. the
    tile DMA on every generation (incl. v5e).
    """
    x = x_ref[...].astype(jnp.float32)               # (tm, d_block)
    r = r_ref[...]                                   # (d_block, fold) f32
    c = c_ref[...]                                   # (fold, d_block) f32
    hp = jax.lax.Precision.HIGHEST

    sums = jnp.dot(x, r, precision=hp, preferred_element_type=jnp.float32)
    sqs = jnp.dot(x * x, r, precision=hp, preferred_element_type=jnp.float32)
    mean = sums * inv_dim                            # (tm, fold)
    var = jnp.maximum(sqs * inv_dim - mean * mean, 0.0)
    inv_std = jax.lax.rsqrt(var + EPS)

    scale_b = jnp.dot(inv_std, c, precision=hp, preferred_element_type=jnp.float32)
    shift_b = jnp.dot(mean * inv_std, c, precision=hp, preferred_element_type=jnp.float32)

    y = x * scale_b - shift_b
    y = y * g_ref[...].astype(jnp.float32) + b_ref[...].astype(jnp.float32)
    o_ref[...] = y.astype(o_ref.dtype)


# ----------------------------------------------------------------------------
# Sizing helpers (generation-aware)
# ----------------------------------------------------------------------------
def _vmem_cap_bytes():
    """~60% of physical per-core VMEM; conservative (v7x) fallback."""
    try:
        info = pltpu.get_tpu_info()
        vmem = getattr(info, "vmem_capacity_bytes", None)
        if vmem:
            return int(vmem * 0.6)
    except Exception:
        pass
    return 38 * 1024 * 1024  # ~60% of v7x's 64 MiB per TensorCore


def _fold_factor(dim, max_lanes=1024):
    """fold = lcm(dim, 128) // dim, or 1 when dim is already lane-dense / too big."""
    if dim % 128 == 0:
        return 1
    fold = 128 // math.gcd(dim, 128)
    if dim * fold > max_lanes:
        return 1
    return fold


def _tile_rows(rows_f, d_block, itemsize, sub, target_tile_bytes):
    """Row tile: ~target_tile_bytes (f32-equivalent) per tile, multiple of the
    sublane packing, never past the sublane-rounded row count, and clamped so
    the parallel grid has >=2 steps (v7x has 2 TensorCores)."""
    if rows_f <= sub:
        return rows_f                                  # full extent: always legal
    bytes_per_row = d_block * max(itemsize, 4)         # size by f32 working set
    tm = max(sub, target_tile_bytes // bytes_per_row)
    tm = (tm // sub) * sub
    tm = min(tm, (rows_f // sub) * sub)
    if rows_f >= 2 * sub:
        tm = min(tm, max(sub, (rows_f // (2 * sub)) * sub))
    return max(tm, sub)


def _vmem_budget(tm, d_block, itemsize, extra_bytes, cap):
    """Double-buffered in/out tiles + params/matrices + f32 working set."""
    tile = tm * d_block * itemsize
    f32_work = 2 * tm * d_block * 4                    # upcast x + one temporary
    params = 2 * d_block * 4
    need = int((2 * (2 * tile + params + extra_bytes) + f32_work) * 1.25)
    return max(16 * 1024 * 1024, min(need, cap))


# ----------------------------------------------------------------------------
# pallas_call wrappers
# ----------------------------------------------------------------------------
def _ln_general_call(x2, gamma, beta, itemsize, sub, target_tile_bytes, cap):
    rows, dim = x2.shape
    g2 = gamma.reshape(1, dim).astype(jnp.float32)
    b2 = beta.reshape(1, dim).astype(jnp.float32)

    tm = _tile_rows(rows, dim, itemsize, sub, target_tile_bytes)
    grid = pl.cdiv(rows, tm)
    vmem_bytes = _vmem_budget(tm, dim, itemsize, 0, cap)

    # NOTE: a partial final block computes mean/var on padded rows and relies on
    # Pallas dropping OOB output writes (rows are independent, so correct).
    return pl.pallas_call(
        functools.partial(_layernorm_kernel, inv_dim=1.0 / dim),
        out_shape=jax.ShapeDtypeStruct((rows, dim), x2.dtype),
        grid_spec=pltpu.PrefetchScalarGridSpec(
            num_scalar_prefetch=0,
            grid=(grid,),
            in_specs=[
                pl.BlockSpec((tm, dim), lambda i: (i, 0)),
                pl.BlockSpec((1, dim), lambda i: (0, 0)),
                pl.BlockSpec((1, dim), lambda i: (0, 0)),
            ],
            out_specs=pl.BlockSpec((tm, dim), lambda i: (i, 0)),
        ),
        compiler_params=pltpu.CompilerParams(
            dimension_semantics=("parallel",),
            vmem_limit_bytes=vmem_bytes,
        ),
    )(x2, g2, b2)


def _ln_fold_call(x3, g_fold, b_fold, dim, fold, itemsize, sub,
                  target_tile_bytes, cap):
    rows_f, d_block = x3.shape

    # Skinny segment-reduce / segment-scatter matrices: compile-time constants.
    r_np = np.kron(np.eye(fold, dtype=np.float32),
                   np.ones((dim, 1), dtype=np.float32))      # (d_block, fold)
    c_np = r_np.T.copy()                                      # (fold, d_block)

    tm = _tile_rows(rows_f, d_block, itemsize, sub, target_tile_bytes)
    grid = pl.cdiv(rows_f, tm)
    vmem_bytes = _vmem_budget(tm, d_block, itemsize,
                              (r_np.size + c_np.size) * 4, cap)

    return pl.pallas_call(
        functools.partial(_layernorm_fold_kernel, inv_dim=1.0 / dim),
        out_shape=jax.ShapeDtypeStruct((rows_f, d_block), x3.dtype),
        grid_spec=pltpu.PrefetchScalarGridSpec(
            num_scalar_prefetch=0,
            grid=(grid,),
            in_specs=[
                pl.BlockSpec((tm, d_block), lambda i: (i, 0)),
                pl.BlockSpec((1, d_block), lambda i: (0, 0)),
                pl.BlockSpec((1, d_block), lambda i: (0, 0)),
                pl.BlockSpec((d_block, fold), lambda i: (0, 0)),
                pl.BlockSpec((fold, d_block), lambda i: (0, 0)),
            ],
            out_specs=pl.BlockSpec((tm, d_block), lambda i: (i, 0)),
        ),
        compiler_params=pltpu.CompilerParams(
            dimension_semantics=("parallel",),
            vmem_limit_bytes=vmem_bytes,
        ),
    )(x3, g_fold, b_fold, jnp.asarray(r_np), jnp.asarray(c_np))


@functools.partial(jax.jit, static_argnames=("target_tile_bytes",))
def layernorm_pallas(x, gamma, beta, gamma_fold=None, beta_fold=None,
                     *, target_tile_bytes=None):
    """LayerNorm over the last axis of x (any leading shape)."""
    orig_shape = x.shape
    dim = orig_shape[-1]
    rows = x.size // dim
    x2 = x.reshape(rows, dim)

    itemsize = jnp.dtype(x.dtype).itemsize
    sub = {4: 8, 2: 16, 1: 32}.get(itemsize, 8)       # sublane packing multiple

    cap = _vmem_cap_bytes()
    if target_tile_bytes is None:
        # ~4-8 MiB per tile: amortizes the ~0.35us/step overhead while leaving
        # room for double buffering under the generation's VMEM cap.
        target_tile_bytes = max(1 * 1024 * 1024, min(8 * 1024 * 1024, cap // 8))

    fold = _fold_factor(dim)

    if fold > 1 and rows >= fold:
        d_block = dim * fold
        rows_bulk = (rows // fold) * fold
        rem = rows - rows_bulk

        if gamma_fold is None:
            gamma_fold = jnp.tile(gamma.reshape(-1).astype(jnp.float32),
                                  (fold,)).reshape(1, d_block)
            beta_fold = jnp.tile(beta.reshape(-1).astype(jnp.float32),
                                 (fold,)).reshape(1, d_block)

        x_bulk = x2 if rem == 0 else x2[:rows_bulk]
        x3 = x_bulk.reshape(rows_bulk // fold, d_block)   # metadata-only when rem == 0
        y3 = _ln_fold_call(x3, gamma_fold, beta_fold, dim, fold,
                           itemsize, sub, target_tile_bytes, cap)
        y_bulk = y3.reshape(rows_bulk, dim)

        if rem == 0:
            y2 = y_bulk
        else:
            # TODO(synk): the < fold leftover rows take the general path and are
            # re-joined with a concatenate (extra copy); ideally handle the tail
            # inside the same kernel.
            y_tail = _ln_general_call(x2[rows_bulk:], gamma, beta,
                                      itemsize, sub, target_tile_bytes, cap)
            y2 = jnp.concatenate([y_bulk, y_tail], axis=0)
    else:
        y2 = _ln_general_call(x2, gamma, beta, itemsize, sub,
                              target_tile_bytes, cap)

    return y2.reshape(orig_shape)


# ----------------------------------------------------------------------------
# Module
# ----------------------------------------------------------------------------
class PreNormPallas:
    """PreNorm: y = fn(LayerNorm(x)). LayerNorm runs in the Pallas kernel."""

    def __init__(self, dim, fn):
        # nn.LayerNorm(dim) default init: weight=1, bias=0 (deterministic).
        self.dim = dim
        self.gamma = jnp.ones((dim,), dtype=jnp.float32)
        self.beta = jnp.zeros((dim,), dtype=jnp.float32)
        self.fn = fn

        # Pre-tile the affine params for the lane-dense fold path (hoisted out
        # of the per-call wrapper; fold depends only on dim).
        fold = _fold_factor(dim)
        if fold > 1:
            d_block = dim * fold
            self.gamma_fold = jnp.tile(self.gamma, (fold,)).reshape(1, d_block)
            self.beta_fold = jnp.tile(self.beta, (fold,)).reshape(1, d_block)
        else:
            self.gamma_fold = None
            self.beta_fold = None

    def __call__(self, x, **kwargs):
        y = layernorm_pallas(x, self.gamma, self.beta,
                             gamma_fold=self.gamma_fold,
                             beta_fold=self.beta_fold)
        return self.fn(y, **kwargs)


# ----------------------------------------------------------------------------
# Reference & test
# ----------------------------------------------------------------------------
def _layernorm_ref(x, gamma, beta):
    xf = x.astype(jnp.float32)
    mean = jnp.mean(xf, axis=-1, keepdims=True)
    var = jnp.mean((xf - mean) ** 2, axis=-1, keepdims=True)
    y = (xf - mean) / jnp.sqrt(var + EPS) * gamma + beta
    return y.astype(x.dtype)


if __name__ == "__main__":
    key = jax.random.PRNGKey(0)

    # (shape, tolerance):
    #  - (2, 8, 32):   lane-dense fold path (fold=4, d_block=128), rows % fold == 0.
    #  - (4, 128, 256): general lane-dense path (dim % 128 == 0), multi-step grid.
    #  - (3, 7, 96):   lcm-based fold (fold=4, d_block=384) with a remainder row
    #                  handled by the general-path tail kernel.
    cases = [
        ((2, 8, 32), 1e-3),
        ((4, 128, 256), 1e-4),
        ((3, 7, 96), 1e-4),
    ]
    for shape, tol in cases:
        key, sub = jax.random.split(key)
        dim = shape[-1]
        x = jax.random.normal(sub, shape, dtype=jnp.float32)

        module = PreNormPallas(dim, fn=lambda t: t)
        y = module(x)
        jax.block_until_ready(y)

        ref = _layernorm_ref(x, module.gamma, module.beta)
        err = float(jnp.max(jnp.abs(y.astype(jnp.float32) - ref.astype(jnp.float32))))
        assert err < tol, f"shape {shape}: max abs err {err} >= {tol}"

    print("KERNEL_OK")
</pallas_src>

<mosaic_0001>
module attributes {stable_mosaic.version = 11 : i64} {
  func.func @_layernorm_fold_kernel(%arg0: i32, %arg1: memref<4x128xf32, #tpu.memory_space<vmem>>, %arg2: memref<1x128xf32, #tpu.memory_space<vmem>>, %arg3: memref<1x128xf32, #tpu.memory_space<vmem>>, %arg4: memref<128x4xf32, #tpu.memory_space<vmem>>, %arg5: memref<4x128xf32, #tpu.memory_space<vmem>>, %arg6: memref<4x128xf32, #tpu.memory_space<vmem>>) attributes {dimension_semantics = [#tpu.dimension_semantics<parallel>], iteration_bounds = array<i64: 1>, scalar_prefetch = 0 : i64, scratch_operands = 0 : i64, tpu.core_type = #tpu.core_type<tc>, window_params = [{transform_indices = @transform_0, window_bounds = array<i64: 4, 128>}, {pipeline_mode = #tpu.pipeline_mode<synchronous>, transform_indices = @transform_1, window_bounds = array<i64: 1, 128>}, {pipeline_mode = #tpu.pipeline_mode<synchronous>, transform_indices = @transform_2, window_bounds = array<i64: 1, 128>}, {pipeline_mode = #tpu.pipeline_mode<synchronous>, transform_indices = @transform_3, window_bounds = array<i64: 128, 4>}, {pipeline_mode = #tpu.pipeline_mode<synchronous>, transform_indices = @transform_4, window_bounds = array<i64: 4, 128>}, {transform_indices = @transform_5, window_bounds = array<i64: 4, 128>}]} {
    %c0 = arith.constant 0 : index
    %c0_0 = arith.constant 0 : index
    %0 = vector.load %arg1[%c0, %c0_0] : memref<4x128xf32, #tpu.memory_space<vmem>>, vector<4x128xf32>
    %c0_1 = arith.constant 0 : index
    %c0_2 = arith.constant 0 : index
    %1 = vector.load %arg4[%c0_1, %c0_2] : memref<128x4xf32, #tpu.memory_space<vmem>>, vector<128x4xf32>
    %c0_3 = arith.constant 0 : index
    %c0_4 = arith.constant 0 : index
    %2 = vector.load %arg5[%c0_3, %c0_4] : memref<4x128xf32, #tpu.memory_space<vmem>>, vector<4x128xf32>
    %cst = arith.constant dense<0.000000e+00> : vector<4x4xf32>
    %3 = tpu.matmul %0, %1, %cst {dimension_numbers = #tpu.dot_dimension_numbers<[1], [0], [0], [1], [0, 0, 1, 1], [], []>, precision = #tpu.contract_precision<fp32>} : vector<4x128xf32>, vector<128x4xf32>, vector<4x4xf32> -> vector<4x4xf32>
    %4 = arith.mulf %0, %0 : vector<4x128xf32>
    %cst_5 = arith.constant dense<0.000000e+00> : vector<4x4xf32>
    %5 = tpu.matmul %4, %1, %cst_5 {dimension_numbers = #tpu.dot_dimension_numbers<[1], [0], [0], [1], [0, 0, 1, 1], [], []>, precision = #tpu.contract_precision<fp32>} : vector<4x128xf32>, vector<128x4xf32>, vector<4x4xf32> -> vector<4x4xf32>
    %cst_6 = arith.constant 3.125000e-02 : f32
    %6 = vector.broadcast %cst_6 : f32 to vector<4x4xf32>
    %7 = arith.mulf %3, %6 : vector<4x4xf32>
    %cst_7 = arith.constant 3.125000e-02 : f32
    %8 = vector.broadcast %cst_7 : f32 to vector<4x4xf32>
    %9 = arith.mulf %5, %8 : vector<4x4xf32>
    %10 = arith.mulf %7, %7 : vector<4x4xf32>
    %11 = arith.subf %9, %10 : vector<4x4xf32>
    %cst_8 = arith.constant 0.000000e+00 : f32
    %12 = vector.broadcast %cst_8 : f32 to vector<4x4xf32>
    %13 = arith.maximumf %11, %12 : vector<4x4xf32>
    %cst_9 = arith.constant 9.99999974E-6 : f32
    %14 = vector.broadcast %cst_9 : f32 to vector<4x4xf32>
    %15 = arith.addf %13, %14 : vector<4x4xf32>
    %16 = math.rsqrt %15 : vector<4x4xf32>
    %cst_10 = arith.constant dense<0.000000e+00> : vector<4x128xf32>
    %17 = tpu.matmul %16, %2, %cst_10 {dimension_numbers = #tpu.dot_dimension_numbers<[1], [0], [0], [1], [0, 0, 1, 1], [], []>, precision = #tpu.contract_precision<fp32>} : vector<4x4xf32>, vector<4x128xf32>, vector<4x128xf32> -> vector<4x128xf32>
    %18 = arith.mulf %7, %16 : vector<4x4xf32>
    %cst_11 = arith.constant dense<0.000000e+00> : vector<4x128xf32>
    %19 = tpu.matmul %18, %2, %cst_11 {dimension_numbers = #tpu.dot_dimension_numbers<[1], [0], [0], [1], [0, 0, 1, 1], [], []>, precision = #tpu.contract_precision<fp32>} : vector<4x4xf32>, vector<4x128xf32>, vector<4x128xf32> -> vector<4x128xf32>
    %20 = arith.mulf %0, %17 : vector<4x128xf32>
    %21 = arith.subf %20, %19 : vector<4x128xf32>
    %c0_12 = arith.constant 0 : index
    %c0_13 = arith.constant 0 : index
    %22 = vector.load %arg2[%c0_12, %c0_13] : memref<1x128xf32, #tpu.memory_space<vmem>>, vector<1x128xf32>
    %23 = vector.broadcast %22 : vector<1x128xf32> to vector<4x128xf32>
    %24 = arith.mulf %21, %23 : vector<4x128xf32>
    %c0_14 = arith.constant 0 : index
    %c0_15 = arith.constant 0 : index
    %25 = vector.load %arg3[%c0_14, %c0_15] : memref<1x128xf32, #tpu.memory_space<vmem>>, vector<1x128xf32>
    %26 = vector.broadcast %25 : vector<1x128xf32> to vector<4x128xf32>
    %27 = arith.addf %24, %26 : vector<4x128xf32>
    %c0_16 = arith.constant 0 : index
    %c0_17 = arith.constant 0 : index
    %28 = vector.load %arg6[%c0_16, %c0_17] : memref<4x128xf32, #tpu.memory_space<vmem>>, vector<4x128xf32>
    tpu.vector_store %arg6[%c0_16, %c0_17], %27 {strides = array<i32>} : memref<4x128xf32, #tpu.memory_space<vmem>>, vector<4x128xf32>,
    return
  }
  func.func @transform_0(%arg0: i32) -> (i32, i32) {
    %c0_i32 = arith.constant 0 : i32
    %c0_i32_0 = arith.constant 0 : i32
    return %arg0, %c0_i32 : i32, i32
  }
  func.func @transform_1(%arg0: i32) -> (i32, i32) {
    %c0_i32 = arith.constant 0 : i32
    %c0_i32_0 = arith.constant 0 : i32
    %c0_i32_1 = arith.constant 0 : i32
    return %c0_i32, %c0_i32_0 : i32, i32
  }
  func.func @transform_2(%arg0: i32) -> (i32, i32) {
    %c0_i32 = arith.constant 0 : i32
    %c0_i32_0 = arith.constant 0 : i32
    %c0_i32_1 = arith.constant 0 : i32
    return %c0_i32, %c0_i32_0 : i32, i32
  }
  func.func @transform_3(%arg0: i32) -> (i32, i32) {
    %c0_i32 = arith.constant 0 : i32
    %c0_i32_0 = arith.constant 0 : i32
    %c0_i32_1 = arith.constant 0 : i32
    return %c0_i32, %c0_i32_0 : i32, i32
  }
  func.func @transform_4(%arg0: i32) -> (i32, i32) {
    %c0_i32 = arith.constant 0 : i32
    %c0_i32_0 = arith.constant 0 : i32
    %c0_i32_1 = arith.constant 0 : i32
    return %c0_i32, %c0_i32_0 : i32, i32
  }
  func.func @transform_5(%arg0: i32) -> (i32, i32) {
    %c0_i32 = arith.constant 0 : i32
    %c0_i32_0 = arith.constant 0 : i32
    return %arg0, %c0_i32 : i32, i32
  }
}

</mosaic_0001>

<bundles_post_ra>
// kernel: layernorm_pallas.1
= control target key start
LH: loop header
LB: loop body
LE: loop exit
PB: predicated region body
PF: predicated region fallthrough
CT: control target
= control target key end

     0   :  { %10 = vsyncpa [#allocation3], 0  ;;  %s3010_s18 = smov [#allocation2]   ;;  %s3758_s0 = inlined_call_operand.vmem [shape: f32[4,128], index: 0, kind: input, shape index: {}]   ;;  %s3759_s1 = inlined_call_operand.vmem [shape: f32[1,128], index: 1, kind: input, shape index: {}]   ;;  %s3760_s2 = inlined_call_operand.vmem [shape: f32[1,128], index: 2, kind: input, shape index: {}]   ;;  %s3761_s3 = inlined_call_operand.hbm [shape: f32[128,4], index: 3, kind: input, shape index: {}]   ;;  %s3762_s4 = inlined_call_operand.vmem [shape: f32[4,128], index: 4, kind: input, shape index: {}]   ;;  %s3763_s5 = inlined_call_operand.vmem [shape: f32[4,128], index: 5, kind: output, shape index: {}]  }
   0x1   :  { %s22_s19 = sshll.u32 %s3010_s18, 4  ;;  %s23_s19 = int_to_ptr.vmem [resolvable:$true] %s22_s19 }
   0x2   :  { %s2996_s20 = scalar_lea.vmem %s23_s19, 2048  ;;  %p3001_p1 = scmp.lt.s32.totalorder %s23_s19, %s23_s19 }
   0x3   :  { %p2997_p0 = scmp.ne.s32.totalorder %s23_s19, %s2996_s20  ;;  %p3002_p2 = scmp.lt.s32.totalorder %s2996_s20, %s2996_s20 }
   0x5   :  { %p3003_p3 = por %p3002_p2, %p3001_p1 }
   0x7   :  { %p3004_p4 = pnand %p3003_p3, %p2997_p0 }
   0x9   :  { %3007 = shalt.err (!%p3004_p4)
}
   0xa   :  { %s3011_s21 = smov 128   ;;  %s3012_s22 = smov 8  }
   0xb   :  { %28 = dma.hbm_to_vmem [thread:$0]  %s3761_s3, 2048, %s23_s19, [#allocation3], %s3011_s21, %s3011_s21, %s3012_s22  }
   0xc   :  { %3008 = dma.done.wait [#allocation3], 2048  }
   0xd   :  { %3009 = vsyncadd [#allocation3], 4294965248  ;;  %v3013_v0 = vmov 0.0   ;;  %vm3014_vm0 = vmmov 0   ;;  %v50_v1 = vld [vmem:[#allocation2 + $0x78] sm:$0xff]  ;;  %v49_v2 = vld [vmem:[#allocation2 + $0x70] sm:$0xff] }
   0xe   :  { %2500 = vmatprep.subr.mxu0 %v3013_v0  ;;  %2535 = vmatprep.subr.mxu1 %v3013_v0  ;;  %v48_v3 = vld [vmem:[#allocation2 + $0x68] sm:$0xff]  ;;  %v3054_v4 = vand.u32 4294901760, %v50_v1  ;;  %v3056_v5 = vand.u32 4294901760, %v49_v2  ;;  %v47_v7 = vld [vmem:[#allocation2 + $0x60] sm:$0xff]  ;;  %v46_v8 = vld [vmem:[#allocation2 + $0x58] sm:$0xff]  ;;  %vm1346_vm1 = vcmask 1043456  }
   0xf   :  { %2532 = vmatprep.mubr.msk.f32.mxu0 %vm3014_vm0, %v3013_v0  ;;  %2567 = vmatprep.mubr.msk.f32.mxu1 %vm3014_vm0, %v3013_v0  ;;  %v3058_v6 = vand.u32 4294901760, %v48_v3  ;;  %v45_v9 = vld [vmem:[#allocation2 + $0x50] sm:$0xff]  ;;  %v3060_v10 = vand.u32 4294901760, %v47_v7  ;;  %v3062_v11 = vand.u32 4294901760, %v46_v8  ;;  %v44_v13 = vld [vmem:[#allocation2 + $0x48] sm:$0xff]  ;;  %v43_v14 = vld [vmem:[#allocation2 + $0x40] sm:$0xff] }
  0x10   :  { %v3064_v12 = vand.u32 4294901760, %v45_v9  ;;  %2501 = vmatpush3.msra.mxu0 %v3054_v4  ;;  %v3068_v15 = vsub.f32 %v50_v1, %v3054_v4  ;;  %v3071_v16 = vsub.f32 %v49_v2, %v3056_v5  ;;  %v3073_v17 = vand.u32 4294901760, %v44_v13  ;;  %v42_v19 = vld [vmem:[#allocation2 + $0x38] sm:$0xff]  ;;  %v41_v26 = vld [vmem:[#allocation2 + $0x30] sm:$0xff]  ;;  %v40_v36 = vld [vmem:[#allocation2 + $0x28] sm:$0xff] }
  0x11   :  { %v3076_v18 = vsub.f32 %v48_v3, %v3058_v6  ;;  %2502 = vmatprep.subr.mxu0 %v3013_v0  ;;  %v3080_v20 = vsub.f32 %v47_v7, %v3060_v10  ;;  %v3083_v21 = vsub.f32 %v46_v8, %v3062_v11  ;;  %v3095_v25 = vand.u32 4294901760, %v43_v14  ;;  %v39_v41 = vld [vmem:[#allocation2 + $0x20] sm:$0xff]  ;;  %v38_v49 = vld [vmem:[#allocation2 + $0x18] sm:$0xff]  ;;  %v37_v54 = vld [vmem:[#allocation2 + $0x10] sm:$0xff] }
  0x12   :  { %2503 = vmatpush3.msra.mxu0 %v3056_v5  ;;  %v3087_v22 = vand.u32 4294901760, %v3068_v15  ;;  %v3090_v23 = vand.u32 4294901760, %v3071_v16  ;;  %v3101_v28 = vand.u32 4294901760, %v42_v19  ;;  %v3107_v30 = vsub.f32 %v45_v9, %v3064_v12  ;;  %v3157_v50 = vld [vmem:[%s3758_s0] sm:$0xf]  ;;  %v36_v60 = vld [vmem:[#allocation2 + $0x8] sm:$0xff] }
  0x13   :  { %v3093_v24 = vand.u32 4294901760, %v3076_v18  ;;  %2504 = vmatprep.subr.mxu0 %v3013_v0  ;;  %v3099_v27 = vand.u32 4294901760, %v3080_v20  ;;  %v3104_v29 = vand.u32 4294901760, %v3083_v21  ;;  %v3117_v34 = vsub.f32 %v44_v13, %v3073_v17  ;;  %v35_v7 = vld [vmem:[#allocation2] sm:$0xff] }
  0x14   :  { %2505 = vmatpush3.msra.mxu0 %v3058_v6  ;;  %v147_v31 = vsub.f32 %v3068_v15, %v3087_v22  ;;  %v154_v32 = vsub.f32 %v3071_v16, %v3090_v23  ;;  %v3120_v35 = vand.u32 4294901760, %v41_v26  ;;  %v3130_v40 = vand.u32 4294901760, %v3107_v30 }
  0x15   :  { %v161_v33 = vsub.f32 %v3076_v18, %v3093_v24  ;;  %2506 = vmatprep.subr.mxu0 %v3013_v0  ;;  %v168_v39 = vsub.f32 %v3080_v20, %v3099_v27  ;;  %v175_v42 = vsub.f32 %v3083_v21, %v3104_v29  ;;  %v3136_v43 = vsub.f32 %v43_v14, %v3095_v25 }
  0x16   :  { %2507 = vmatpush3.msra.mxu0 %v3060_v10  ;;  %v3123_v37 = vand.u32 4294901760, %v147_v31  ;;  %v3125_v38 = vand.u32 4294901760, %v154_v32  ;;  %v3142_v45 = vand.u32 4294901760, %v40_v36  ;;  %v3145_v46 = vand.u32 4294901760, %v3117_v34 }
  0x17   :  { %2508 = vmatprep.subr.mxu0 %v3013_v0  ;;  %v3140_v44 = vand.u32 4294901760, %v161_v33  ;;  %v3148_v47 = vsub.f32 %v42_v19, %v3101_v28  ;;  %v3152_v48 = vand.u32 4294901760, %v39_v41  ;;  %v3161_v51 = vand.u32 4294901760, %v168_v39 }
  0x18   :  { %2509 = vmatpush3.msra.mxu0 %v3062_v11  ;;  %2536 = vmatpush3.msra.mxu1 %v3123_v37  ;;  %v182_v52 = vsub.f32 %v3107_v30, %v3130_v40  ;;  %v3166_v53 = vand.u32 4294901760, %v3136_v43  ;;  %v3169_v55 = vsub.f32 %v41_v26, %v3120_v35  ;;  %v3173_v56 = vand.u32 4294901760, %v175_v42 }
  0x19   :  { %3772 = vst [vmem:[#allocation5_spill] sm:$0xff] %v3140_v44  ;;  %2510 = vmatprep.subr.mxu0 %v3013_v0  ;;  %2537 = vmatprep.subr.mxu1 %v3013_v0  ;;  %3773 = vst [vmem:[#allocation6_spill] sm:$0xff] %v3161_v51  ;;  %v3176_v57 = vand.u32 4294901760, %v3148_v47  ;;  %v189_v58 = vsub.f32 %v3117_v34, %v3145_v46  ;;  %v3182_v59 = vand.u32 4294901760, %v38_v49  ;;  %v3188_v62 = vand.u32 4294901760, %v3157_v50 }
  0x1a   :  { %2511 = vmatpush3.msra.mxu0 %v3064_v12  ;;  %2538 = vmatpush3.msra.mxu1 %v3125_v38  ;;  %3774 = vst [vmem:[#allocation7_spill] sm:$0xff] %v3173_v56  ;;  %v3185_v61 = vsub.f32 %v40_v36, %v3142_v45  ;;  %v3192_v63 = vand.u32 4294901760, %v37_v54  ;;  %v3196_v1 = vand.u32 4294901760, %v182_v52  ;;  %v196_v2 = vsub.f32 %v3136_v43, %v3166_v53 }
  0x1b   :  { %2512 = vmatprep.subr.mxu0 %v3013_v0  ;;  %2539 = vmatprep.subr.mxu1 %v3013_v0  ;;  %v3201_v3 = vand.u32 4294901760, %v3169_v55  ;;  %v3204_v8 = vsub.f32 %v39_v41, %v3152_v48  ;;  %v203_v9 = vsub.f32 %v3148_v47, %v3176_v57  ;;  %v3210_v13 = vand.u32 4294901760, %v36_v60 }
  0x1c   :  { %2513 = vmatpush3.msra.mxu0 %v3073_v17  ;;  %2540 = vmatpush3.msra.mxu1 %v3140_v44  ;;  %3775 = vst [vmem:[#allocation8_spill] sm:$0xff] %v3196_v1  ;;  %v3214_v14 = vand.u32 4294901760, %v189_v58  ;;  %v3217_v19 = vand.u32 4294901760, %v3185_v61  ;;  %v3221_v26 = vsub.f32 %v3157_v50, %v3188_v62  ;;  %v3224_v31 = vsub.f32 %v38_v49, %v3182_v59 }
  0x1d   :  { %2514 = vmatprep.subr.mxu0 %v3013_v0  ;;  %2541 = vmatprep.subr.mxu1 %v3013_v0  ;;  %v3228_v32 = vand.u32 4294901760, %v35_v7  ;;  %v3232_v33 = vand.u32 4294901760, %v196_v2  ;;  %v210_v36 = vsub.f32 %v3169_v55, %v3201_v3  ;;  %v3237_v39 = vand.u32 4294901760, %v3204_v8 }
  0x1e   :  { %2515 = vmatpush3.msra.mxu0 %v3095_v25  ;;  %2542 = vmatpush3.msra.mxu1 %v3161_v51  ;;  %3776 = vst [vmem:[#allocation9_spill] sm:$0xff] %v3214_v14  ;;  %v3240_v41 = vsub.f32 %v37_v54, %v3192_v63  ;;  %v3244_v42 = vand.u32 4294901760, %v203_v9  ;;  %v217_v49 = vsub.f32 %v3185_v61, %v3217_v19  ;;  %v3252_v58 = vand.u32 4294901760, %v3224_v31 }
  0x1f   :  { %2516 = vmatprep.subr.mxu0 %v3013_v0  ;;  %2543 = vmatprep.subr.mxu1 %v3013_v0  ;;  %3777 = vst [vmem:[#allocation10_spill] sm:$0xff] %v3232_v33  ;;  %v3255_v54 = vsub.f32 %v36_v60, %v3210_v13  ;;  %v3261_v2 = vand.u32 4294901760, %v210_v36  ;;  %v224_v9 = vsub.f32 %v3204_v8, %v3237_v39  ;;  %v3780_v36 = vand.u32 4294901760, %v3221_v26 }
  0x20   :  { %2517 = vmatpush3.msra.mxu0 %v3101_v28  ;;  %2544 = vmatpush3.msra.mxu1 %v3173_v56  ;;  %3778 = vst [vmem:[#allocation11_spill] sm:$0xff] %v3244_v42  ;;  %v3266_v52 = vand.u32 4294901760, %v3240_v41  ;;  %v3275_v60 = vand.u32 4294901760, %v217_v49  ;;  %vm1342_vm2 = vcmask 31744  }
  0x21   :  { %2518 = vmatprep.subr.mxu0 %v3013_v0  ;;  %2545 = vmatprep.subr.mxu1 %v3013_v0  ;;  %3779 = vst [vmem:[#allocation12_spill] sm:$0xff] %v3261_v2  ;;  %v3289_v49 = vand.u32 4294901760, %v224_v9 }
  0x22   :  { %2519 = vmatpush3.msra.mxu0 %v3120_v35  ;;  %2546 = vmatpush3.msra.mxu1 %v3196_v1  ;;  %v231_v1 = vsub.f32 %v3224_v31, %v3252_v58 }
  0x23   :  { %2520 = vmatprep.subr.mxu0 %v3013_v0  ;;  %2547 = vmatprep.subr.mxu1 %v3013_v0 }
  0x24   :  { %2521 = vmatpush3.msra.mxu0 %v3142_v45  ;;  %2548 = vmatpush3.msra.mxu1 %v3214_v14  ;;  %v3269_v14 = vsub.f32 %v35_v7, %v3228_v32  ;;  %v3283_v7 = vand.u32 4294901760, %v3255_v54  ;;  %v3300_v51 = vand.u32 4294901760, %v231_v1 }
  0x25   :  { %2522 = vmatprep.subr.mxu0 %v3013_v0  ;;  %2549 = vmatprep.subr.mxu1 %v3013_v0 }
  0x26   :  { %2523 = vmatpush3.msra.mxu0 %v3152_v48  ;;  %2550 = vmatpush3.msra.mxu1 %v3232_v33  ;;  %v136_v33 = vsub.f32 %v3221_v26, %v3780_v36  ;;  %v3294_v36 = vand.u32 4294901760, %v3269_v14  ;;  %v245_v9 = vsub.f32 %v3255_v54, %v3283_v7 }
  0x27   :  { %2524 = vmatprep.subr.mxu0 %v3013_v0  ;;  %2551 = vmatprep.subr.mxu1 %v3013_v0 }
  0x28   :  { %2525 = vmatpush3.msra.mxu0 %v3182_v59  ;;  %2552 = vmatpush3.msra.mxu1 %v3244_v42  ;;  %v238_v42 = vsub.f32 %v3240_v41, %v3266_v52  ;;  %v137_v56 = vand.u32 4294901760, %v136_v33  ;;  %v252_v44 = vsub.f32 %v3269_v14, %v3294_v36  ;;  %v3315_v1 = vand.u32 4294901760, %v245_v9  ;;  %v3786_v9 = vld [vmem:[#allocation9_spill] sm:$0xff] }
  0x29   :  { %2526 = vmatprep.subr.mxu0 %v3013_v0  ;;  %2553 = vmatprep.subr.mxu1 %v3013_v0 }
  0x2a   :  { %2527 = vmatpush3.msra.mxu0 %v3192_v63  ;;  %2554 = vmatpush3.msra.mxu1 %v3261_v2  ;;  %v3308_v2 = vand.u32 4294901760, %v238_v42  ;;  %v3321_v33 = vand.u32 4294901760, %v252_v44  ;;  %v3781_v44 = vand.u32 4294901760, %v3221_v26  ;;  %v3785_v42 = vld [vmem:[#allocation8_spill] sm:$0xff] }
  0x2b   :  { %2528 = vmatprep.subr.mxu0 %v3013_v0  ;;  %2555 = vmatprep.subr.mxu1 %v3013_v0 }
  0x2c   :  { %2529 = vmatpush3.msra.mxu0 %v3210_v13  ;;  %2556 = vmatpush3.msra.mxu1 %v3275_v60 }
  0x2d   :  { %2530 = vmatprep.subr.mxu0 %v3013_v0  ;;  %2557 = vmatprep.subr.mxu1 %v3013_v0 }
  0x2e   :  { %2531 = vmatpush3.msra.mxu0 %v3228_v32  ;;  %2558 = vmatpush3.msra.mxu1 %v3289_v49 }
  0x2f   :  { %2559 = vmatprep.subr.mxu1 %v3013_v0  ;;  %2570 = vmatprep.subr.mxu0 %v3013_v0 }
  0x30   :  { %2533 = vmatmul.mubr.f32.vlgmr.msra.gmra.mxu0 %v137_v56  ;;  %2560 = vmatpush3.msra.mxu1 %v3300_v51  ;;  %v693_v56 = vmul.f32 %v3157_v50, %v3157_v50  ;;  %v3783_v50 = vld [vmem:[#allocation6_spill] sm:$0xff] }
  0x31   :  { %2571 = vmatpush3.msra.mxu0 %v3068_v15  ;;  %2561 = vmatprep.subr.mxu1 %v3013_v0 }
  0x32   :  { %2572 = vmatprep.subr.mxu0 %v3013_v0  ;;  %2562 = vmatpush3.msra.mxu1 %v3308_v2 }
  0x33   :  { %2573 = vmatpush3.msra.mxu0 %v3071_v16  ;;  %2563 = vmatprep.subr.mxu1 %v3013_v0 }
  0x34   :  { %2574 = vmatprep.subr.mxu0 %v3013_v0  ;;  %2564 = vmatpush3.msra.mxu1 %v3315_v1 }
  0x35   :  { %2575 = vmatpush3.msra.mxu0 %v3076_v18  ;;  %2565 = vmatprep.subr.mxu1 %v3013_v0 }
  0x36   :  { %2576 = vmatprep.subr.mxu0 %v3013_v0  ;;  %2566 = vmatpush3.msra.mxu1 %v3321_v33 }
  0x37   :  { %2577 = vmatpush3.msra.mxu0 %v3080_v20  ;;  %2568 = vmatmul.mubr.f32.vlgmr.msra.gmra.mxu1 %v3188_v62 }
  0x38   :  { %2578 = vmatprep.subr.mxu0 %v3013_v0  ;;  %2605 = vmatprep.subr.mxu1 %v3013_v0 }
  0x39   :  { %2579 = vmatpush3.msra.mxu0 %v3083_v21  ;;  %2606 = vmatpush3.msra.mxu1 %v3054_v4 }
  0x3a   :  { %2580 = vmatprep.subr.mxu0 %v3013_v0  ;;  %2607 = vmatprep.subr.mxu1 %v3013_v0 }
  0x3b   :  { %2581 = vmatpush3.msra.mxu0 %v3107_v30  ;;  %2608 = vmatpush3.msra.mxu1 %v3056_v5 }
  0x3c   :  { %2582 = vmatprep.subr.mxu0 %v3013_v0  ;;  %2609 = vmatprep.subr.mxu1 %v3013_v0 }
  0x3d   :  { %2583 = vmatpush3.msra.mxu0 %v3117_v34  ;;  %2610 = vmatpush3.msra.mxu1 %v3058_v6 }
  0x3e   :  { %2584 = vmatprep.subr.mxu0 %v3013_v0  ;;  %2611 = vmatprep.subr.mxu1 %v3013_v0 }
  0x3f   :  { %2585 = vmatpush3.msra.mxu0 %v3136_v43  ;;  %2612 = vmatpush3.msra.mxu1 %v3060_v10 }
  0x40   :  { %2586 = vmatprep.subr.mxu0 %v3013_v0  ;;  %2613 = vmatprep.subr.mxu1 %v3013_v0 }
  0x41   :  { %2587 = vmatpush3.msra.mxu0 %v3148_v47  ;;  %2614 = vmatpush3.msra.mxu1 %v3062_v11 }
  0x42   :  { %2588 = vmatprep.subr.mxu0 %v3013_v0  ;;  %2615 = vmatprep.subr.mxu1 %v3013_v0 }
  0x43   :  { %2589 = vmatpush3.msra.mxu0 %v3169_v55  ;;  %2616 = vmatpush3.msra.mxu1 %v3064_v12 }
  0x44   :  { %2590 = vmatprep.subr.mxu0 %v3013_v0  ;;  %2617 = vmatprep.subr.mxu1 %v3013_v0 }
  0x45   :  { %2591 = vmatpush3.msra.mxu0 %v3185_v61  ;;  %2618 = vmatpush3.msra.mxu1 %v3073_v17 }
  0x46   :  { %2592 = vmatprep.subr.mxu0 %v3013_v0  ;;  %2619 = vmatprep.subr.mxu1 %v3013_v0 }
  0x47   :  { %2593 = vmatpush3.msra.mxu0 %v3204_v8  ;;  %2620 = vmatpush3.msra.mxu1 %v3095_v25 }
  0x48   :  { %2594 = vmatprep.subr.mxu0 %v3013_v0  ;;  %2621 = vmatprep.subr.mxu1 %v3013_v0 }
  0x49   :  { %2595 = vmatpush3.msra.mxu0 %v3224_v31  ;;  %2622 = vmatpush3.msra.mxu1 %v3101_v28 }
  0x4a   :  { %2596 = vmatprep.subr.mxu0 %v3013_v0  ;;  %2623 = vmatprep.subr.mxu1 %v3013_v0 }
  0x4b   :  { %2597 = vmatpush3.msra.mxu0 %v3240_v41  ;;  %2624 = vmatpush3.msra.mxu1 %v3120_v35 }
  0x4c   :  { %2598 = vmatprep.subr.mxu0 %v3013_v0  ;;  %2625 = vmatprep.subr.mxu1 %v3013_v0 }
  0x4d   :  { %2599 = vmatpush3.msra.mxu0 %v3255_v54  ;;  %2626 = vmatpush3.msra.mxu1 %v3142_v45 }
  0x4e   :  { %2600 = vmatprep.subr.mxu0 %v3013_v0  ;;  %2627 = vmatprep.subr.mxu1 %v3013_v0 }
  0x4f   :  { %2601 = vmatpush3.msra.mxu0 %v3269_v14  ;;  %2602 = vmatprep.mubr.msk.f32.mxu0 %vm3014_vm0, %v3013_v0 }
  0x50   :  { %2628 = vmatpush3.msra.mxu1 %v3152_v48  ;;  %2603 = vmatmul.mubr.f32.vlgmr.msra.gmra.mxu0 %v3221_v26 }
  0x51   :  { %2629 = vmatprep.subr.mxu1 %v3013_v0  ;;  %2640 = vmatprep.subr.mxu0 %v3013_v0 }
  0x52   :  { %2630 = vmatpush3.msra.mxu1 %v3182_v59  ;;  %2641 = vmatpush3.msra.mxu0 %v3087_v22 }
  0x53   :  { %2631 = vmatprep.subr.mxu1 %v3013_v0  ;;  %2642 = vmatprep.subr.mxu0 %v3013_v0 }
  0x54   :  { %2632 = vmatpush3.msra.mxu1 %v3192_v63  ;;  %2643 = vmatpush3.msra.mxu0 %v3090_v23 }
  0x55   :  { %2633 = vmatprep.subr.mxu1 %v3013_v0  ;;  %2644 = vmatprep.subr.mxu0 %v3013_v0 }
  0x56   :  { %2634 = vmatpush3.msra.mxu1 %v3210_v13  ;;  %2645 = vmatpush3.msra.mxu0 %v3093_v24 }
  0x57   :  { %2635 = vmatprep.subr.mxu1 %v3013_v0  ;;  %2646 = vmatprep.subr.mxu0 %v3013_v0 }
  0x58   :  { %2636 = vmatpush3.msra.mxu1 %v3228_v32  ;;  %2637 = vmatprep.mubr.msk.f32.mxu1 %vm3014_vm0, %v3013_v0 }
  0x59   :  { %2647 = vmatpush3.msra.mxu0 %v3099_v27  ;;  %2638 = vmatmul.mubr.f32.vlgmr.msra.gmra.mxu1 %v3781_v44 }
  0x5a   :  { %2648 = vmatprep.subr.mxu0 %v3013_v0  ;;  %2675 = vmatprep.subr.mxu1 %v3013_v0 }
  0x5b   :  { %2649 = vmatpush3.msra.mxu0 %v3104_v29  ;;  %2676 = vmatpush3.msra.mxu1 %v3054_v4 }
  0x5c   :  { %2650 = vmatprep.subr.mxu0 %v3013_v0  ;;  %2677 = vmatprep.subr.mxu1 %v3013_v0 }
  0x5d   :  { %2651 = vmatpush3.msra.mxu0 %v3130_v40  ;;  %2678 = vmatpush3.msra.mxu1 %v3056_v5 }
  0x5e   :  { %2652 = vmatprep.subr.mxu0 %v3013_v0  ;;  %2679 = vmatprep.subr.mxu1 %v3013_v0 }
  0x5f   :  { %2653 = vmatpush3.msra.mxu0 %v3145_v46  ;;  %2680 = vmatpush3.msra.mxu1 %v3058_v6 }
  0x60   :  { %2654 = vmatprep.subr.mxu0 %v3013_v0  ;;  %2681 = vmatprep.subr.mxu1 %v3013_v0 }
  0x61   :  { %2655 = vmatpush3.msra.mxu0 %v3166_v53  ;;  %2682 = vmatpush3.msra.mxu1 %v3060_v10 }
  0x62   :  { %2656 = vmatprep.subr.mxu0 %v3013_v0  ;;  %2683 = vmatprep.subr.mxu1 %v3013_v0 }
  0x63   :  { %2657 = vmatpush3.msra.mxu0 %v3176_v57  ;;  %2684 = vmatpush3.msra.mxu1 %v3062_v11 }
  0x64   :  { %2658 = vmatprep.subr.mxu0 %v3013_v0  ;;  %2685 = vmatprep.subr.mxu1 %v3013_v0 }
  0x65   :  { %2659 = vmatpush3.msra.mxu0 %v3201_v3  ;;  %2686 = vmatpush3.msra.mxu1 %v3064_v12 }
  0x66   :  { %2660 = vmatprep.subr.mxu0 %v3013_v0  ;;  %2687 = vmatprep.subr.mxu1 %v3013_v0 }
  0x67   :  { %2661 = vmatpush3.msra.mxu0 %v3217_v19  ;;  %2688 = vmatpush3.msra.mxu1 %v3073_v17 }
  0x68   :  { %2662 = vmatprep.subr.mxu0 %v3013_v0  ;;  %2689 = vmatprep.subr.mxu1 %v3013_v0 }
  0x69   :  { %2663 = vmatpush3.msra.mxu0 %v3237_v39  ;;  %2690 = vmatpush3.msra.mxu1 %v3095_v25 }
  0x6a   :  { %2664 = vmatprep.subr.mxu0 %v3013_v0  ;;  %2691 = vmatprep.subr.mxu1 %v3013_v0 }
  0x6b   :  { %2665 = vmatpush3.msra.mxu0 %v3252_v58  ;;  %2692 = vmatpush3.msra.mxu1 %v3101_v28 }
  0x6c   :  { %2666 = vmatprep.subr.mxu0 %v3013_v0  ;;  %2693 = vmatprep.subr.mxu1 %v3013_v0 }
  0x6d   :  { %2667 = vmatpush3.msra.mxu0 %v3266_v52  ;;  %2694 = vmatpush3.msra.mxu1 %v3120_v35 }
  0x6e   :  { %2668 = vmatprep.subr.mxu0 %v3013_v0  ;;  %2695 = vmatprep.subr.mxu1 %v3013_v0 }
  0x6f   :  { %2669 = vmatpush3.msra.mxu0 %v3283_v7  ;;  %2696 = vmatpush3.msra.mxu1 %v3142_v45 }
  0x70   :  { %2670 = vmatprep.subr.mxu0 %v3013_v0  ;;  %2697 = vmatprep.subr.mxu1 %v3013_v0 }
  0x71   :  { %2671 = vmatpush3.msra.mxu0 %v3294_v36  ;;  %2672 = vmatprep.mubr.msk.f32.mxu0 %vm3014_vm0, %v3013_v0 }
  0x72   :  { %2698 = vmatpush3.msra.mxu1 %v3152_v48  ;;  %2673 = vmatmul.mubr.f32.vlgmr.msra.gmra.mxu0 %v3188_v62 }
  0x73   :  { %2699 = vmatprep.subr.mxu1 %v3013_v0  ;;  %2710 = vmatprep.subr.mxu0 %v3013_v0 }
  0x74   :  { %2700 = vmatpush3.msra.mxu1 %v3182_v59  ;;  %2711 = vmatpush3.msra.mxu0 %v3054_v4 }
  0x75   :  { %2701 = vmatprep.subr.mxu1 %v3013_v0  ;;  %2712 = vmatprep.subr.mxu0 %v3013_v0 }
  0x76   :  { %2702 = vmatpush3.msra.mxu1 %v3192_v63  ;;  %2713 = vmatpush3.msra.mxu0 %v3056_v5 }
  0x77   :  { %2703 = vmatprep.subr.mxu1 %v3013_v0  ;;  %2714 = vmatprep.subr.mxu0 %v3013_v0 }
  0x78   :  { %2704 = vmatpush3.msra.mxu1 %v3210_v13  ;;  %2715 = vmatpush3.msra.mxu0 %v3058_v6 }
  0x79   :  { %2705 = vmatprep.subr.mxu1 %v3013_v0  ;;  %2716 = vmatprep.subr.mxu0 %v3013_v0 }
  0x7a   :  { %2706 = vmatpush3.msra.mxu1 %v3228_v32  ;;  %2707 = vmatprep.mubr.msk.f32.mxu1 %vm3014_vm0, %v3013_v0 }
  0x7b   :  { %2717 = vmatpush3.msra.mxu0 %v3060_v10  ;;  %2708 = vmatmul.mubr.f32.vlgmr.msra.gmra.mxu1 %v3188_v62  ;;  %v3782_v62 = vld [vmem:[#allocation5_spill] sm:$0xff] }
  0x7c   :  { %2718 = vmatprep.subr.mxu0 %v3013_v0  ;;  %2745 = vmatprep.subr.mxu1 %v3013_v0 }
  0x7d   :  { %2719 = vmatpush3.msra.mxu0 %v3062_v11  ;;  %2746 = vmatpush3.msra.mxu1 %v3123_v37  ;;  %v3488_v37 = vand.u32 4294901760, %v693_v56 }
  0x7e   :  { %2720 = vmatprep.subr.mxu0 %v3013_v0  ;;  %2747 = vmatprep.subr.mxu1 %v3013_v0 }
  0x7f   :  { %2721 = vmatpush3.msra.mxu0 %v3064_v12  ;;  %2748 = vmatpush3.msra.mxu1 %v3125_v38  ;;  %v3784_v38 = vld [vmem:[#allocation7_spill] sm:$0xff]  ;;  %v3499_v26 = vsub.f32 %v693_v56, %v3488_v37  ;;  %v3787_v56 = vld [vmem:[#allocation10_spill] sm:$0xff] }
  0x80   :  { %2722 = vmatprep.subr.mxu0 %v3013_v0  ;;  %2749 = vmatprep.subr.mxu1 %v3013_v0 }
  0x81   :  { %2723 = vmatpush3.msra.mxu0 %v3073_v17  ;;  %2750 = vmatpush3.msra.mxu1 %v3782_v62  ;;  %v777_v44 = vand.u32 4294901760, %v3499_v26  ;;  %v3788_v62 = vld [vmem:[#allocation11_spill] sm:$0xff] }
  0x82   :  { %2724 = vmatprep.subr.mxu0 %v3013_v0  ;;  %2751 = vmatprep.subr.mxu1 %v3013_v0 }
  0x83   :  { %2725 = vmatpush3.msra.mxu0 %v3095_v25  ;;  %2752 = vmatpush3.msra.mxu1 %v3783_v50  ;;  %v778_v50 = vsub.f32 %v3499_v26, %v777_v44 }
  0x84   :  { %2726 = vmatprep.subr.mxu0 %v3013_v0  ;;  %2753 = vmatprep.subr.mxu1 %v3013_v0 }
  0x85   :  { %2727 = vmatpush3.msra.mxu0 %v3101_v28  ;;  %2754 = vmatpush3.msra.mxu1 %v3784_v38  ;;  %v3789_v38 = vld [vmem:[#allocation12_spill] sm:$0xff] }
  0x86   :  { %2728 = vmatprep.subr.mxu0 %v3013_v0  ;;  %2755 = vmatprep.subr.mxu1 %v3013_v0 }
  0x87   :  { %2729 = vmatpush3.msra.mxu0 %v3120_v35  ;;  %2756 = vmatpush3.msra.mxu1 %v3785_v42  ;;  %v779_v42 = vand.u32 4294901760, %v778_v50 }
  0x88   :  { %2730 = vmatprep.subr.mxu0 %v3013_v0  ;;  %2757 = vmatprep.subr.mxu1 %v3013_v0 }
  0x89   :  { %2731 = vmatpush3.msra.mxu0 %v3142_v45  ;;  %2758 = vmatpush3.msra.mxu1 %v3786_v9 }
  0x8a   :  { %2732 = vmatprep.subr.mxu0 %v3013_v0  ;;  %2759 = vmatprep.subr.mxu1 %v3013_v0 }
  0x8b   :  { %2733 = vmatpush3.msra.mxu0 %v3152_v48  ;;  %2760 = vmatpush3.msra.mxu1 %v3787_v56 }
  0x8c   :  { %2734 = vmatprep.subr.mxu0 %v3013_v0  ;;  %2761 = vmatprep.subr.mxu1 %v3013_v0 }
  0x8d   :  { %2735 = vmatpush3.msra.mxu0 %v3182_v59  ;;  %2762 = vmatpush3.msra.mxu1 %v3788_v62 }
  0x8e   :  { %2736 = vmatprep.subr.mxu0 %v3013_v0  ;;  %2763 = vmatprep.subr.mxu1 %v3013_v0 }
  0x8f   :  { %2737 = vmatpush3.msra.mxu0 %v3192_v63  ;;  %2764 = vmatpush3.msra.mxu1 %v3789_v38 }
  0x90   :  { %2738 = vmatprep.subr.mxu0 %v3013_v0  ;;  %2765 = vmatprep.subr.mxu1 %v3013_v0 }
  0x91   :  { %2739 = vmatpush3.msra.mxu0 %v3210_v13  ;;  %2766 = vmatpush3.msra.mxu1 %v3275_v60 }
  0x92   :  { %2740 = vmatprep.subr.mxu0 %v3013_v0  ;;  %2767 = vmatprep.subr.mxu1 %v3013_v0 }
  0x93   :  { %2741 = vmatpush3.msra.mxu0 %v3228_v32  ;;  %2768 = vmatpush3.msra.mxu1 %v3289_v49 }
  0x94   :  { %2742 = vmatprep.mubr.msk.f32.mxu0 %vm3014_vm0, %v3013_v0  ;;  %2769 = vmatprep.subr.mxu1 %v3013_v0 }
  0x95   :  { %2780 = vmatprep.subr.mxu0 %v3013_v0  ;;  %2743 = vmatmul.mubr.f32.vlgmr.msra.gmra.mxu0 %v779_v42 }
  0x96   :  { %2770 = vmatpush3.msra.mxu1 %v3300_v51  ;;  %2781 = vmatpush3.msra.mxu0 %v3068_v15 }
  0x97   :  { %2771 = vmatprep.subr.mxu1 %v3013_v0  ;;  %2782 = vmatprep.subr.mxu0 %v3013_v0 }
  0x98   :  { %2772 = vmatpush3.msra.mxu1 %v3308_v2  ;;  %2783 = vmatpush3.msra.mxu0 %v3071_v16 }
  0x99   :  { %2773 = vmatprep.subr.mxu1 %v3013_v0  ;;  %2784 = vmatprep.subr.mxu0 %v3013_v0 }
  0x9a   :  { %2774 = vmatpush3.msra.mxu1 %v3315_v1  ;;  %2785 = vmatpush3.msra.mxu0 %v3076_v18 }
  0x9b   :  { %2775 = vmatprep.subr.mxu1 %v3013_v0  ;;  %2786 = vmatprep.subr.mxu0 %v3013_v0 }
  0x9c   :  { %2776 = vmatpush3.msra.mxu1 %v3321_v33  ;;  %2777 = vmatprep.mubr.msk.f32.mxu1 %vm3014_vm0, %v3013_v0 }
  0x9d   :  { %2787 = vmatpush3.msra.mxu0 %v3080_v20  ;;  %2778 = vmatmul.mubr.f32.vlgmr.msra.gmra.mxu1 %v3488_v37 }
  0x9e   :  { %2788 = vmatprep.subr.mxu0 %v3013_v0  ;;  %2815 = vmatprep.subr.mxu1 %v3013_v0 }
  0x9f   :  { %2789 = vmatpush3.msra.mxu0 %v3083_v21  ;;  %2816 = vmatpush3.msra.mxu1 %v3054_v4  ;;  %v51_v21 = vld [vmem:[%s3762_s4] sm:$0xf] }
  0xa0   :  { %2790 = vmatprep.subr.mxu0 %v3013_v0  ;;  %2817 = vmatprep.subr.mxu1 %v3013_v0 }
  0xa1   :  { %2791 = vmatpush3.msra.mxu0 %v3107_v30  ;;  %2818 = vmatpush3.msra.mxu1 %v3056_v5 }
  0xa2   :  { %2792 = vmatprep.subr.mxu0 %v3013_v0  ;;  %2819 = vmatprep.subr.mxu1 %v3013_v0 }
  0xa3   :  { %2793 = vmatpush3.msra.mxu0 %v3117_v34  ;;  %2820 = vmatpush3.msra.mxu1 %v3058_v6 }
  0xa4   :  { %2794 = vmatprep.subr.mxu0 %v3013_v0  ;;  %2821 = vmatprep.subr.mxu1 %v3013_v0 }
  0xa5   :  { %2795 = vmatpush3.msra.mxu0 %v3136_v43  ;;  %2822 = vmatpush3.msra.mxu1 %v3060_v10 }
  0xa6   :  { %2796 = vmatprep.subr.mxu0 %v3013_v0  ;;  %2823 = vmatprep.subr.mxu1 %v3013_v0 }
  0xa7   :  { %2797 = vmatpush3.msra.mxu0 %v3148_v47  ;;  %2824 = vmatpush3.msra.mxu1 %v3062_v11 }
  0xa8   :  { %2798 = vmatprep.subr.mxu0 %v3013_v0  ;;  %2825 = vmatprep.subr.mxu1 %v3013_v0 }
  0xa9   :  { %2799 = vmatpush3.msra.mxu0 %v3169_v55  ;;  %2826 = vmatpush3.msra.mxu1 %v3064_v12 }
  0xaa   :  { %2800 = vmatprep.subr.mxu0 %v3013_v0  ;;  %2827 = vmatprep.subr.mxu1 %v3013_v0 }
  0xab   :  { %2801 = vmatpush3.msra.mxu0 %v3185_v61  ;;  %2828 = vmatpush3.msra.mxu1 %v3073_v17 }
  0xac   :  { %2802 = vmatprep.subr.mxu0 %v3013_v0  ;;  %2829 = vmatprep.subr.mxu1 %v3013_v0 }
  0xad   :  { %2803 = vmatpush3.msra.mxu0 %v3204_v8  ;;  %2830 = vmatpush3.msra.mxu1 %v3095_v25 }
  0xae   :  { %2804 = vmatprep.subr.mxu0 %v3013_v0  ;;  %2831 = vmatprep.subr.mxu1 %v3013_v0 }
  0xaf   :  { %2805 = vmatpush3.msra.mxu0 %v3224_v31  ;;  %2832 = vmatpush3.msra.mxu1 %v3101_v28 }
  0xb0   :  { %2806 = vmatprep.subr.mxu0 %v3013_v0  ;;  %2833 = vmatprep.subr.mxu1 %v3013_v0 }
  0xb1   :  { %2807 = vmatpush3.msra.mxu0 %v3240_v41  ;;  %2834 = vmatpush3.msra.mxu1 %v3120_v35 }
  0xb2   :  { %2808 = vmatprep.subr.mxu0 %v3013_v0  ;;  %2835 = vmatprep.subr.mxu1 %v3013_v0 }
  0xb3   :  { %2809 = vmatpush3.msra.mxu0 %v3255_v54  ;;  %2836 = vmatpush3.msra.mxu1 %v3142_v45 }
  0xb4   :  { %2810 = vmatprep.subr.mxu0 %v3013_v0  ;;  %2837 = vmatprep.subr.mxu1 %v3013_v0 }
  0xb5   :  { %2811 = vmatpush3.msra.mxu0 %v3269_v14  ;;  %2812 = vmatprep.mubr.msk.f32.mxu0 %vm3014_vm0, %v3013_v0 }
  0xb6   :  { %2838 = vmatpush3.msra.mxu1 %v3152_v48  ;;  %2813 = vmatmul.mubr.f32.vlgmr.msra.gmra.mxu0 %v3499_v26 }
  0xb7   :  { %2839 = vmatprep.subr.mxu1 %v3013_v0  ;;  %2850 = vmatprep.subr.mxu0 %v3013_v0 }
  0xb8   :  { %2840 = vmatpush3.msra.mxu1 %v3182_v59  ;;  %2851 = vmatpush3.msra.mxu0 %v3087_v22  ;;  %v1348_v22 = vsel %vm1346_vm1, %v51_v21, 0 }
  0xb9   :  { %2841 = vmatprep.subr.mxu1 %v3013_v0  ;;  %2852 = vmatprep.subr.mxu0 %v3013_v0 }
  0xba   :  { %2842 = vmatpush3.msra.mxu1 %v3192_v63  ;;  %2853 = vmatpush3.msra.mxu0 %v3090_v23  ;;  %v3696_v23 = vand.u32 4294901760, %v1348_v22 }
  0xbb   :  { %2843 = vmatprep.subr.mxu1 %v3013_v0  ;;  %2854 = vmatprep.subr.mxu0 %v3013_v0 }
  0xbc   :  { %2844 = vmatpush3.msra.mxu1 %v3210_v13  ;;  %2855 = vmatpush3.msra.mxu0 %v3093_v24  ;;  %v3699_v24 = vsub.f32 %v1348_v22, %v3696_v23 }
  0xbd   :  { %2845 = vmatprep.subr.mxu1 %v3013_v0  ;;  %2856 = vmatprep.subr.mxu0 %v3013_v0 }
  0xbe   :  { %2846 = vmatpush3.msra.mxu1 %v3228_v32  ;;  %2847 = vmatprep.mubr.msk.f32.mxu1 %vm3014_vm0, %v3013_v0 }
  0xbf   :  { %2857 = vmatpush3.msra.mxu0 %v3099_v27  ;;  %2848 = vmatmul.mubr.f32.vlgmr.msra.gmra.mxu1 %v777_v44  ;;  %v3704_v27 = vand.u32 4294901760, %v3699_v24 }
  0xc0   :  { %2858 = vmatprep.subr.mxu0 %v3013_v0  ;;  %2885 = vmatprep.subr.mxu1 %v3013_v0 }
  0xc1   :  { %2859 = vmatpush3.msra.mxu0 %v3104_v29  ;;  %2886 = vmatpush3.msra.mxu1 %v3054_v4  ;;  %v1460_v30 = vsub.f32 %v3699_v24, %v3704_v27 }
  0xc2   :  { %2860 = vmatprep.subr.mxu0 %v3013_v0  ;;  %2887 = vmatprep.subr.mxu1 %v3013_v0 }
  0xc3   :  { %2861 = vmatpush3.msra.mxu0 %v3130_v40  ;;  %2888 = vmatpush3.msra.mxu1 %v3056_v5  ;;  %v1461_v34 = vand.u32 4294901760, %v1460_v30 }
  0xc4   :  { %2862 = vmatprep.subr.mxu0 %v3013_v0  ;;  %2889 = vmatprep.subr.mxu1 %v3013_v0 }
  0xc5   :  { %2863 = vmatpush3.msra.mxu0 %v3145_v46  ;;  %2890 = vmatpush3.msra.mxu1 %v3058_v6 }
  0xc6   :  { %2864 = vmatprep.subr.mxu0 %v3013_v0  ;;  %2891 = vmatprep.subr.mxu1 %v3013_v0 }
  0xc7   :  { %2865 = vmatpush3.msra.mxu0 %v3166_v53  ;;  %2892 = vmatpush3.msra.mxu1 %v3060_v10 }
  0xc8   :  { %2866 = vmatprep.subr.mxu0 %v3013_v0  ;;  %2893 = vmatprep.subr.mxu1 %v3013_v0 }
  0xc9   :  { %2867 = vmatpush3.msra.mxu0 %v3176_v57  ;;  %2894 = vmatpush3.msra.mxu1 %v3062_v11 }
  0xca   :  { %2868 = vmatprep.subr.mxu0 %v3013_v0  ;;  %2895 = vmatprep.subr.mxu1 %v3013_v0 }
  0xcb   :  { %2869 = vmatpush3.msra.mxu0 %v3201_v3  ;;  %2896 = vmatpush3.msra.mxu1 %v3064_v12 }
  0xcc   :  { %2870 = vmatprep.subr.mxu0 %v3013_v0  ;;  %2897 = vmatprep.subr.mxu1 %v3013_v0 }
  0xcd   :  { %2871 = vmatpush3.msra.mxu0 %v3217_v19  ;;  %2898 = vmatpush3.msra.mxu1 %v3073_v17 }
  0xce   :  { %2872 = vmatprep.subr.mxu0 %v3013_v0  ;;  %2899 = vmatprep.subr.mxu1 %v3013_v0 }
  0xcf   :  { %2873 = vmatpush3.msra.mxu0 %v3237_v39  ;;  %2900 = vmatpush3.msra.mxu1 %v3095_v25 }
  0xd0   :  { %2874 = vmatprep.subr.mxu0 %v3013_v0  ;;  %2901 = vmatprep.subr.mxu1 %v3013_v0 }
  0xd1   :  { %2875 = vmatpush3.msra.mxu0 %v3252_v58  ;;  %2902 = vmatpush3.msra.mxu1 %v3101_v28 }
  0xd2   :  { %2876 = vmatprep.subr.mxu0 %v3013_v0  ;;  %2903 = vmatprep.subr.mxu1 %v3013_v0 }
  0xd3   :  { %2877 = vmatpush3.msra.mxu0 %v3266_v52  ;;  %2904 = vmatpush3.msra.mxu1 %v3120_v35 }
  0xd4   :  { %2878 = vmatprep.subr.mxu0 %v3013_v0  ;;  %2905 = vmatprep.subr.mxu1 %v3013_v0 }
  0xd5   :  { %2879 = vmatpush3.msra.mxu0 %v3283_v7  ;;  %2906 = vmatpush3.msra.mxu1 %v3142_v45 }
  0xd6   :  { %2880 = vmatprep.subr.mxu0 %v3013_v0  ;;  %2907 = vmatprep.subr.mxu1 %v3013_v0 }
  0xd7   :  { %2881 = vmatpush3.msra.mxu0 %v3294_v36  ;;  %2882 = vmatprep.mubr.msk.f32.mxu0 %vm3014_vm0, %v3013_v0 }
  0xd8   :  { %2908 = vmatpush3.msra.mxu1 %v3152_v48  ;;  %2883 = vmatmul.mubr.f32.vlgmr.msra.gmra.mxu0 %v3488_v37 }
  0xd9   :  { %2909 = vmatprep.subr.mxu1 %v3013_v0  ;;  %2917 = vmatprep.mubr.msk.f32.mxu1 %vm3014_vm0, %v3013_v0 }
  0xda   :  { %2910 = vmatpush3.msra.mxu1 %v3182_v59  ;;  %2920 = vmatprep.subr.mxu0 %v3013_v0 }
  0xdb   :  { %2911 = vmatprep.subr.mxu1 %v3013_v0  ;;  %2922 = vmatprep.mubr.msk.f32.mxu0 %vm3014_vm0, %v3013_v0 }
  0xdc   :  { %2912 = vmatpush3.msra.mxu1 %v3192_v63  ;;  %2921 = vmatpush3.msra.mxu0 %v3696_v23 }
  0xdd   :  { %2913 = vmatprep.subr.mxu1 %v3013_v0  ;;  %2930 = vmatprep.subr.mxu0 %v3013_v0 }
  0xde   :  { %2914 = vmatpush3.msra.mxu1 %v3210_v13 }
  0xdf   :  { %2915 = vmatprep.subr.mxu1 %v3013_v0 }
  0xe0   :  { %2916 = vmatpush3.msra.mxu1 %v3228_v32 }
  0xe1   :  { %2918 = vmatmul.mubr.f32.vlgmr.msra.gmra.mxu1 %v3488_v37  ;;  %2925 = vmatprep.subr.mxu1 %v3013_v0 }
  0xe2   :  { %2927 = vmatprep.mubr.msk.f32.mxu1 %vm3014_vm0, %v3013_v0  ;;  %2926 = vmatpush3.msra.mxu1 %v1461_v34 }
  0xe3   :  { %2935 = vmatprep.subr.mxu1 %v3013_v0 }
  0xf0   :  { %v139_v4 = vpop.f32.mrf.mxu0 }
  0xf2   :  { %v2534_v5 = vpop.f32.mrf.mxu0 }
  0xf7   :  { %v290_v6 = vpop.f32.mrf.mxu1 }
  0xf8   :  { %v291_v10 = vadd.f32 %v290_v6, %v139_v4 }
  0xf9   :  { %v2569_v11 = vpop.f32.mrf.mxu1 }
 0x110   :  { %v394_v12 = vpop.f32.mrf.mxu0 }
 0x111   :  { %v395_v15 = vadd.f32 %v394_v12, %v291_v10 }
 0x112   :  { %v2604_v16 = vpop.f32.mrf.mxu0 }
 0x119   :  { %v483_v17 = vpop.f32.mrf.mxu1 }
 0x11a   :  { %v484_v18 = vadd.f32 %v483_v17, %v395_v15 }
 0x11b   :  { %v2639_v20 = vpop.f32.mrf.mxu1 }
 0x132   :  { %v602_v25 = vpop.f32.mrf.mxu0 }
 0x133   :  { %v603_v28 = vadd.f32 %v602_v25, %v484_v18 }
 0x134   :  { %v2674_v29 = vpop.f32.mrf.mxu0 }
 0x13b   :  { %v689_v35 = vpop.f32.mrf.mxu1 }
 0x13c   :  { %v690_v40 = vadd.f32 %v689_v35, %v603_v28 }
 0x13d   :  { %v2709_v43 = vpop.f32.mrf.mxu1 }
 0x13e   :  { %v1335_v13 = vmul.f32 0.03125, %v690_v40 }
 0x140   :  { %v1337_v39 = vmul.f32 %v1335_v13, %v1335_v13 }
 0x155   :  { %v781_v45 = vpop.f32.mrf.mxu0 }
 0x157   :  { %v2744_v46 = vpop.f32.mrf.mxu0 }
 0x15d   :  { %v932_v47 = vpop.f32.mrf.mxu1 }
 0x15e   :  { %v933_v61 = vadd.f32 %v932_v47, %v781_v45 }
 0x15f   :  { %v2779_v48 = vpop.f32.mrf.mxu1 }
 0x176   :  { %v1036_v51 = vpop.f32.mrf.mxu0 }
 0x177   :  { %v1037_v3 = vadd.f32 %v1036_v51, %v933_v61  ;;  %v2270_v61 = vld [vmem:[%s3759_s1] ss:$0 sm:$0xff] }
 0x178   :  { %v2814_v53 = vpop.f32.mrf.mxu0 }
 0x17f   :  { %v1125_v55 = vpop.f32.mrf.mxu1 }
 0x180   :  { %v1126_v8 = vadd.f32 %v1125_v55, %v1037_v3  ;;  %v2987_v55 = vld [vmem:[%s3758_s0] sm:$0xf] }
 0x181   :  { %v2849_v57 = vpop.f32.mrf.mxu1  ;;  %v2271_v3 = vld [vmem:[%s3760_s2] ss:$0 sm:$0xff] }
 0x198   :  { %v1244_v59 = vpop.f32.mrf.mxu0 }
 0x199   :  { %v1245_v14 = vadd.f32 %v1244_v59, %v1126_v8 }
 0x19a   :  { %v2884_v63 = vpop.f32.mrf.mxu0 }
 0x1a1   :  { %v1331_v19 = vpop.f32.mrf.mxu1 }
 0x1a2   :  { %v1332_v31 = vadd.f32 %v1331_v19, %v1245_v14 }
 0x1a3   :  { %v2919_v32 = vpop.f32.mrf.mxu1 }
 0x1a4   :  { %v1336_v41 = vmul.f32 0.03125, %v1332_v31 }
 0x1a6   :  { %v1338_v52 = vsub.f32 %v1336_v41, %v1337_v39 }
 0x1a8   :  { %v1339_v58 = vmax.f32 %v1338_v52, 0.0 }
 0x1aa   :  { %v1340_v54 = vadd.f32 1e-05, %v1339_v58 }
 0x1ac   :  { %2985 = vrsqrt.f32 %v1340_v54 }
 0x1b9   :  { %v2986_v2 = vpop.eup %2985 }
 0x1ba   :  { %v1344_v60 = vsel %vm1342_vm2, %v2986_v2, 0  ;;  %v1796_v7 = vmul.f32 %v2986_v2, %v1335_v13 }
 0x1bb   :  { %v1416_v49 = vand.u32 4294901760, %v1344_v60 }
 0x1bc   :  { %v1798_v36 = vsel %vm1342_vm2, %v1796_v7, 0 }
 0x1bd   :  { %v1417_v1 = vsub.f32 %v1344_v60, %v1416_v49  ;;  %2928 = vmatmul.mubr.f32.vlgmr.msra.gmra.mxu1 %v1416_v49  ;;  %v1866_v37 = vand.u32 4294901760, %v1798_v36 }
 0x1be   :  { %2936 = vmatpush3.msra.mxu1 %v3696_v23  ;;  %2937 = vmatprep.mubr.msk.f32.mxu1 %vm3014_vm0, %v3013_v0 }
 0x1bf   :  { %v1418_v33 = vand.u32 4294901760, %v1417_v1  ;;  %2945 = vmatprep.subr.mxu1 %v3013_v0  ;;  %v1867_v44 = vsub.f32 %v1798_v36, %v1866_v37 }
 0x1c1   :  { %2938 = vmatmul.mubr.f32.vlgmr.msra.gmra.mxu1 %v1418_v33  ;;  %v1419_v26 = vsub.f32 %v1417_v1, %v1418_v33  ;;  %v1868_v56 = vand.u32 4294901760, %v1867_v44 }
 0x1c2   :  { %2946 = vmatpush3.msra.mxu1 %v3696_v23  ;;  %2947 = vmatprep.mubr.msk.f32.mxu1 %vm3014_vm0, %v3013_v0 }
 0x1c3   :  { %v1420_v9 = vand.u32 4294901760, %v1419_v26  ;;  %2955 = vmatprep.subr.mxu1 %v3013_v0  ;;  %v1869_v62 = vsub.f32 %v1867_v44, %v1868_v56 }
 0x1c5   :  { %2923 = vmatmul.mubr.f32.vlgmr.msra.gmra.mxu0 %v1420_v9  ;;  %2948 = vmatmul.mubr.f32.vlgmr.msra.gmra.mxu1 %v1416_v49  ;;  %v1870_v50 = vand.u32 4294901760, %v1869_v62 }
 0x1c6   :  { %2931 = vmatpush3.msra.mxu0 %v3699_v24  ;;  %2932 = vmatprep.mubr.msk.f32.mxu0 %vm3014_vm0, %v3013_v0 }
 0x1c7   :  { %2940 = vmatprep.subr.mxu0 %v3013_v0  ;;  %2956 = vmatpush3.msra.mxu1 %v1461_v34 }
 0x1c8   :  { %2957 = vmatprep.mubr.msk.f32.mxu1 %vm3014_vm0, %v3013_v0  ;;  %2965 = vmatprep.subr.mxu1 %v3013_v0 }
 0x1c9   :  { %2933 = vmatmul.mubr.f32.vlgmr.msra.gmra.mxu0 %v1417_v1  ;;  %2958 = vmatmul.mubr.f32.vlgmr.msra.gmra.mxu1 %v1866_v37 }
 0x1ca   :  { %2941 = vmatpush3.msra.mxu0 %v3704_v27  ;;  %2942 = vmatprep.mubr.msk.f32.mxu0 %vm3014_vm0, %v3013_v0 }
 0x1cb   :  { %2950 = vmatprep.subr.mxu0 %v3013_v0  ;;  %2966 = vmatpush3.msra.mxu1 %v3696_v23 }
 0x1cc   :  { %2967 = vmatprep.mubr.msk.f32.mxu1 %vm3014_vm0, %v3013_v0  ;;  %2975 = vmatprep.subr.mxu1 %v3013_v0 }
 0x1cd   :  { %2943 = vmatmul.mubr.f32.vlgmr.msra.gmra.mxu0 %v1416_v49  ;;  %2968 = vmatmul.mubr.f32.vlgmr.msra.gmra.mxu1 %v1868_v56 }
 0x1ce   :  { %2951 = vmatpush3.msra.mxu0 %v3696_v23  ;;  %2952 = vmatprep.mubr.msk.f32.mxu0 %vm3014_vm0, %v3013_v0 }
 0x1cf   :  { %2960 = vmatprep.subr.mxu0 %v3013_v0  ;;  %2976 = vmatpush3.msra.mxu1 %v3696_v23 }
 0x1d0   :  { %2977 = vmatprep.mubr.msk.f32.mxu1 %vm3014_vm0, %v3013_v0 }
 0x1d1   :  { %2953 = vmatmul.mubr.f32.vlgmr.msra.gmra.mxu0 %v1870_v50  ;;  %2978 = vmatmul.mubr.f32.vlgmr.msra.gmra.mxu1 %v1866_v37 }
 0x1d2   :  { %2961 = vmatpush3.msra.mxu0 %v3699_v24  ;;  %2962 = vmatprep.mubr.msk.f32.mxu0 %vm3014_vm0, %v3013_v0 }
 0x1d3   :  { %2970 = vmatprep.subr.mxu0 %v3013_v0 }
 0x1d5   :  { %2963 = vmatmul.mubr.f32.vlgmr.msra.gmra.mxu0 %v1867_v44 }
 0x1d6   :  { %2971 = vmatpush3.msra.mxu0 %v3704_v27  ;;  %2972 = vmatprep.mubr.msk.f32.mxu0 %vm3014_vm0, %v3013_v0 }
 0x1d9   :  { %2973 = vmatmul.mubr.f32.vlgmr.msra.gmra.mxu0 %v1866_v37 }
 0x27d   :  { %v1498_v38 = vpop.f32.mrf.mxu1 }
 0x27f   :  { %v2929_v42 = vpop.f32.mrf.mxu1 }
 0x281   :  { %v1646_v4 = vpop.f32.mrf.mxu1 }
 0x283   :  { %v2939_v5 = vpop.f32.mrf.mxu1 }
 0x285   :  { %v1422_v6 = vpop.f32.mrf.mxu0  ;;  %v1792_v10 = vpop.f32.mrf.mxu1 }
 0x286   :  { %v1499_v17 = vadd.f32 %v1498_v38, %v1422_v6 }
 0x287   :  { %v2924_v11 = vpop.f32.mrf.mxu0  ;;  %v2949_v12 = vpop.f32.mrf.mxu1 }
 0x289   :  { %v1572_v15 = vpop.f32.mrf.mxu0  ;;  %v1948_v16 = vpop.f32.mrf.mxu1 }
 0x28a   :  { %v1573_v21 = vadd.f32 %v1572_v15, %v1499_v17 }
 0x28b   :  { %v2934_v18 = vpop.f32.mrf.mxu0  ;;  %v2959_v20 = vpop.f32.mrf.mxu1 }
 0x28c   :  { %v1647_v0 = vadd.f32 %v1646_v4, %v1573_v21 }
 0x28d   :  { %v1720_v22 = vpop.f32.mrf.mxu0  ;;  %v2096_v23 = vpop.f32.mrf.mxu1 }
 0x28e   :  { %v1721_v34 = vadd.f32 %v1720_v22, %v1647_v0 }
 0x28f   :  { %v2944_v24 = vpop.f32.mrf.mxu0  ;;  %v2969_v25 = vpop.f32.mrf.mxu1 }
 0x290   :  { %v1793_v46 = vadd.f32 %v1792_v10, %v1721_v34 }
 0x291   :  { %v1872_v27 = vpop.f32.mrf.mxu0  ;;  %v2242_v28 = vpop.f32.mrf.mxu1 }
 0x292   :  { %v1949_v35 = vadd.f32 %v1948_v16, %v1872_v27  ;;  %v2246_v57 = vmul.f32 %v2987_v55, %v1793_v46 }
 0x293   :  { %v2954_v29 = vpop.f32.mrf.mxu0  ;;  %v2979_v30 = vpop.f32.mrf.mxu1 }
 0x295   :  { %v2022_v40 = vpop.f32.mrf.mxu0 }
 0x296   :  { %v2023_v43 = vadd.f32 %v2022_v40, %v1949_v35 }
 0x297   :  { %v2964_v45 = vpop.f32.mrf.mxu0 }
 0x298   :  { %v2097_v47 = vadd.f32 %v2096_v23, %v2023_v43 }
 0x299   :  { %v2170_v48 = vpop.f32.mrf.mxu0 }
 0x29a   :  { %v2171_v51 = vadd.f32 %v2170_v48, %v2097_v47 }
 0x29b   :  { %v2974_v53 = vpop.f32.mrf.mxu0 }
 0x29c   :  { %v2243_v59 = vadd.f32 %v2242_v28, %v2171_v51 }
 0x29e   :  { %v2247_v63 = vsub.f32 %v2246_v57, %v2243_v59 }
 0x2a0   :  { %v2255_v8 = vmul.f32 %v2270_v61, %v2247_v63 }
 0x2a2   :  { %v2263_v13 = vadd.f32 %v2271_v3, %v2255_v8 }
 0x2a4   :  { %2264 = vst [vmem:[%s3763_s5] sm:$0xf] %v2263_v13 }
 0x2a5   :  { %2269 = vsyncpa [#allocation3], 1 }

</bundles_post_ra>
